<compile_context>
chip_gen: v7x
topology: tpu7x:2x2x1
jax: 0.10.0
libtpu: 0.0.40
codegen_flags: <defaults>
</compile_context>

<pallas_src>
import functools

import jax
import jax.numpy as jnp
from jax.experimental import pallas as pl
from jax.experimental.pallas import tpu as pltpu


# ----------------------------------------------------------------------------- helpers


def _pick_tile(dim, target, align):
    """Largest `align`-aligned divisor of `dim` that is <= target; full dim otherwise."""
    if dim <= target:
        return dim
    t = (target // align) * align
    while t >= align:
        if dim % t == 0:
            return t
        t -= align
    return dim  # fall back to a single full-extent block (always legal)


@functools.lru_cache(maxsize=1)
def _vmem_budget_bytes():
    """Conservative per-kernel VMEM budget derived from the actual chip (v5e/v6e/v7x aware)."""
    try:
        cap = pltpu.get_tpu_info().vmem_capacity_bytes
        if cap:
            return min(cap // 4, 32 * 1024 * 1024)
    except Exception:
        pass
    return 16 * 1024 * 1024  # safe default (v5e scoped VMEM)


def _big_vmem():
    return _vmem_budget_bytes() >= 24 * 1024 * 1024


def _erf_approx(x):
    # Abramowitz & Stegun 7.1.26 rational approximation, |error| <= 1.5e-7.
    p = 0.3275911
    a1, a2, a3, a4, a5 = (0.254829592, -0.284496736, 1.421413741,
                          -1.453152027, 1.061405429)
    ax = jnp.abs(x)
    # Full-precision EUP reciprocal (precision-sensitive); division off the VALU slots.
    t = pl.reciprocal(1.0 + p * ax, approx=False)
    poly = ((((a5 * t + a4) * t + a3) * t + a2) * t + a1) * t
    y = 1.0 - poly * jnp.exp(-(ax * ax))
    return jnp.where(x < 0.0, -y, y)


def _gelu(x):
    # Exact (erf-based) GELU, matching PyTorch nn.GELU() default.
    return 0.5 * x * (1.0 + _erf_approx(x * 0.7071067811865476))


# ----------------------------------------------------------------------------- Linear (LN + residual fused)


def _make_linear_kernel(has_ln, has_residual, eps):
    def kernel(*refs):
        idx = 0
        x_ref = refs[idx]; idx += 1
        g_ref = beta_ref = r_ref = None
        if has_ln:
            g_ref = refs[idx]; idx += 1
            beta_ref = refs[idx]; idx += 1
        w_ref = refs[idx]; idx += 1
        if has_residual:
            r_ref = refs[idx]; idx += 1
        o_ref = refs[idx]
        acc_ref = refs[idx + 1]

        @pl.when(pl.program_id(2) == 0)
        def _init():
            acc_ref[...] = jnp.zeros_like(acc_ref)

        x = x_ref[...]
        if has_ln:  # requires the full K row in one block (asserted in the wrapper)
            mean = jnp.mean(x, axis=-1, keepdims=True)
            xc = x - mean
            var = jnp.mean(xc * xc, axis=-1, keepdims=True)
            x = (xc * jax.lax.rsqrt(var + eps)) * g_ref[...] + beta_ref[...]
        # bf16 MXU operands (when weights are pre-cast to bf16), f32 accumulation.
        acc_ref[...] += jnp.dot(x.astype(w_ref.dtype), w_ref[...],
                                preferred_element_type=jnp.float32)

        @pl.when(pl.program_id(2) == pl.num_programs(2) - 1)
        def _fin():
            y = acc_ref[...]
            if has_residual:
                y = y + r_ref[...]
            o_ref[...] = y.astype(o_ref.dtype)

    return kernel


def linear(x2d, w, *, ln=None, residual=None, eps=1e-5):
    """out = (LN(x2d) if ln else x2d) @ w (+ residual), epilogue fused into the matmul.

    x2d: [M, K] f32; w: [K, N] (f32 or pre-cast bf16); ln: (gamma[1,K], beta[1,K]);
    residual: [M, N] f32.
    """
    M, K = x2d.shape
    K2, N = w.shape
    assert K == K2
    big = _big_vmem()
    tm = _pick_tile(M, 512 if big else 256, 8)
    tn = _pick_tile(N, 512 if big else 256, 128)
    if ln is not None:
        tk = K  # LN fusion needs the whole row in a single K block
    else:
        tk = _pick_tile(K, 1024 if big else 512, 128)

    in_specs = [pl.BlockSpec((tm, tk), lambda i, j, k: (i, k))]
    operands = [x2d]
    if ln is not None:
        g, b = ln
        in_specs += [pl.BlockSpec((1, K), lambda i, j, k: (0, 0)),
                     pl.BlockSpec((1, K), lambda i, j, k: (0, 0))]
        operands += [g, b]
    in_specs.append(pl.BlockSpec((tk, tn), lambda i, j, k: (k, j)))
    operands.append(w)
    if residual is not None:
        # Only consumed in the k==last finalize.
        # TODO(synk): pipeline_mode=pl.Buffered(1) here if VMEM gets tight at larger tiles.
        in_specs.append(pl.BlockSpec((tm, tn), lambda i, j, k: (i, j)))
        operands.append(residual)

    kernel = _make_linear_kernel(ln is not None, residual is not None, eps)
    return pl.pallas_call(
        kernel,
        out_shape=jax.ShapeDtypeStruct((M, N), x2d.dtype),
        grid_spec=pltpu.PrefetchScalarGridSpec(
            num_scalar_prefetch=0,
            grid=(M // tm, N // tn, K // tk),
            in_specs=in_specs,
            out_specs=pl.BlockSpec((tm, tn), lambda i, j, k: (i, j)),
            scratch_shapes=[pltpu.VMEM((tm, tn), jnp.float32)],
        ),
        compiler_params=pltpu.CompilerParams(
            dimension_semantics=("parallel", "parallel", "arbitrary")),
    )(*operands)


# ----------------------------------------------------------------------------- Fused FFN (LN2 + W1 + GELU + W2 + residual)


def _ffn_kernel(x_ref, g_ref, b_ref, w1_ref, b1_ref, w2_ref, b2_ref, o_ref,
                h_ref, acc_ref, *, eps):
    # grid = (M//tm, F//tf).  x_ref (residual + LN input): [tm, D]; w1_ref: [D, tf];
    # b1_ref: [1, tf]; w2_ref: [tf, D]; b2_ref: [1, D]; o_ref: [tm, D].
    # h_ref: VMEM [tm, D] LN output (weight dtype); acc_ref: VMEM [tm, D] f32.
    @pl.when(pl.program_id(1) == 0)
    def _init():
        x = x_ref[...]
        mean = jnp.mean(x, axis=-1, keepdims=True)
        xc = x - mean
        var = jnp.mean(xc * xc, axis=-1, keepdims=True)
        h = (xc * jax.lax.rsqrt(var + eps)) * g_ref[...] + b_ref[...]
        h_ref[...] = h.astype(h_ref.dtype)
        acc_ref[...] = jnp.zeros_like(acc_ref)

    # The [tm, tf] GELU intermediate never leaves VMEM / vregs.
    f = jnp.dot(h_ref[...], w1_ref[...], preferred_element_type=jnp.float32)
    f = _gelu(f + b1_ref[...])
    acc_ref[...] += jnp.dot(f.astype(w2_ref.dtype), w2_ref[...],
                            preferred_element_type=jnp.float32)

    @pl.when(pl.program_id(1) == pl.num_programs(1) - 1)
    def _fin():
        o_ref[...] = (acc_ref[...] + b2_ref[...] + x_ref[...]).astype(o_ref.dtype)


def ffn(x2d, gamma, beta, w1, b1, w2, b2, *, eps=1e-5):
    """out = x2d + GELU(LN(x2d) @ w1 + b1) @ w2 + b2, fully fused (d_ff stays in VMEM)."""
    M, D = x2d.shape
    D2, F = w1.shape
    assert D == D2
    big = _big_vmem()
    tm = _pick_tile(M, 256, 8)
    tf = _pick_tile(F, 512 if big else 256, 128)
    return pl.pallas_call(
        functools.partial(_ffn_kernel, eps=eps),
        out_shape=jax.ShapeDtypeStruct((M, D), x2d.dtype),
        grid_spec=pltpu.PrefetchScalarGridSpec(
            num_scalar_prefetch=0,
            grid=(M // tm, F // tf),
            in_specs=[
                pl.BlockSpec((tm, D), lambda i, f: (i, 0)),
                pl.BlockSpec((1, D), lambda i, f: (0, 0)),
                pl.BlockSpec((1, D), lambda i, f: (0, 0)),
                pl.BlockSpec((D, tf), lambda i, f: (0, f)),
                pl.BlockSpec((1, tf), lambda i, f: (0, f)),
                pl.BlockSpec((tf, D), lambda i, f: (f, 0)),
                pl.BlockSpec((1, D), lambda i, f: (0, 0)),
            ],
            out_specs=pl.BlockSpec((tm, D), lambda i, f: (i, 0)),
            scratch_shapes=[pltpu.VMEM((tm, D), w1.dtype),
                            pltpu.VMEM((tm, D), jnp.float32)],
        ),
        compiler_params=pltpu.CompilerParams(
            dimension_semantics=("parallel", "arbitrary")),
    )(x2d, gamma, beta, w1, b1, w2, b2)


# ----------------------------------------------------------------------------- Multi-head attention (per-head grid)


def _mha_kernel(qkv_ref, bias_ref, o_ref, *, n_head, d_k, d_key, use_bf16):
    # qkv_ref : [S, 3*d_key]  (packed q|k|v, q already pre-scaled by 1/sqrt(d_k) via the weight)
    # bias_ref: [S, S]        (this head's relative-position bias, sliced by index_map)
    # o_ref   : [S, d_key]    (context, written per head into its column slice)
    h_idx = pl.program_id(1)
    cdt = jnp.bfloat16 if use_bf16 else jnp.float32

    def head_body(hh):
        q = qkv_ref[:, hh * d_k:(hh + 1) * d_k].astype(cdt)
        k = qkv_ref[:, d_key + hh * d_k:d_key + (hh + 1) * d_k].astype(cdt)
        v = qkv_ref[:, 2 * d_key + hh * d_k:2 * d_key + (hh + 1) * d_k].astype(cdt)
        s = jax.lax.dot_general(q, k, (((1,), (1,)), ((), ())),
                                preferred_element_type=jnp.float32)   # [S, S]
        s = s + bias_ref[...]
        s = s - jnp.max(s, axis=-1, keepdims=True)
        p = jnp.exp(s)
        denom = jnp.sum(p, axis=-1, keepdims=True)
        # Approx EUP reciprocal on the fast (bf16) path; full precision otherwise.
        p = p * pl.reciprocal(denom, approx=use_bf16)
        ctx = jnp.dot(p.astype(cdt), v, preferred_element_type=jnp.float32)
        o_ref[:, hh * d_k:(hh + 1) * d_k] = ctx.astype(o_ref.dtype)

    # Static per-head branches selected by the head grid index (no dynamic lane slicing).
    for hh in range(n_head):
        pl.when(h_idx == hh)(functools.partial(head_body, hh))


def multi_head_attention(qkv, bias, n_head, d_k, use_bf16):
    """qkv: [B, S, 3*d_key] packed projections; bias: [n_head, S, S]. Returns [B, S, d_key]."""
    B, S, three_dkey = qkv.shape
    d_key = three_dkey // 3
    return pl.pallas_call(
        functools.partial(_mha_kernel, n_head=n_head, d_k=d_k, d_key=d_key,
                          use_bf16=use_bf16),
        out_shape=jax.ShapeDtypeStruct((B, S, d_key), jnp.float32),
        grid_spec=pltpu.PrefetchScalarGridSpec(
            num_scalar_prefetch=0,
            grid=(B, n_head),
            in_specs=[
                # qkv / out block indices are constant over the head axis -> DMA'd once per b.
                pl.BlockSpec((None, S, three_dkey), lambda b, h: (b, 0, 0)),
                # bias is tiled per head: only one [S, S] slice resident at a time.
                pl.BlockSpec((None, S, S), lambda b, h: (h, 0, 0)),
            ],
            out_specs=pl.BlockSpec((None, S, d_key), lambda b, h: (b, 0, 0)),
        ),
        compiler_params=pltpu.CompilerParams(
            dimension_semantics=("parallel", "arbitrary")),
    )(qkv, bias)


# ----------------------------------------------------------------------------- Parameter prep & encoder forward


def prepare_params(raw, use_bf16):
    """Fuse QKV weights (folding 1/sqrt(d_k) into Q), reshape LN/bias params, pre-cast to bf16."""
    n_head, d_k = raw["n_head"], raw["d_k"]
    wdt = jnp.bfloat16 if use_bf16 else jnp.float32
    layers = []
    for p in raw["layers"]:
        wq_scaled = p["wq"] / (float(d_k) ** 0.5)
        wqkv = jnp.concatenate([wq_scaled, p["wk"], p["wv"]], axis=1).astype(wdt)
        layers.append(dict(
            ln1_g=p["ln1_g"].reshape(1, -1), ln1_b=p["ln1_b"].reshape(1, -1),
            wqkv=wqkv, wo=p["wo"].astype(wdt),
            ln2_g=p["ln2_g"].reshape(1, -1), ln2_b=p["ln2_b"].reshape(1, -1),
            w1=p["w1"].astype(wdt), b1=p["b1"].reshape(1, -1),
            w2=p["w2"].astype(wdt), b2=p["b2"].reshape(1, -1),
        ))
    return dict(layers=layers, n_head=n_head, d_k=d_k, use_bf16=use_bf16)


def transformer_encoder(x, bias, params):
    """x: [B, S, d_model]; bias: [n_head, S, S]. Mirrors TransformerEncoder.forward (eval mode)."""
    B, S, D = x.shape
    n_head, d_k = params["n_head"], params["d_k"]
    use_bf16 = params["use_bf16"]
    d_key = n_head * d_k
    x2 = x.reshape(B * S, D)
    for p in params["layers"]:
        # --- x = x + MHA(LN1(x), bias) --- (LN fused into the QKV matmul; residual fused into Wo)
        qkv = linear(x2, p["wqkv"], ln=(p["ln1_g"], p["ln1_b"]))          # [B*S, 3*d_key]
        ctx = multi_head_attention(qkv.reshape(B, S, 3 * d_key), bias,
                                   n_head, d_k, use_bf16)                 # [B, S, d_key]
        x2 = linear(ctx.reshape(B * S, d_key), p["wo"], residual=x2)      # [B*S, D]
        # --- x = x + FFN(LN2(x)) --- (single fused kernel, d_ff intermediate stays in VMEM)
        x2 = ffn(x2, p["ln2_g"], p["ln2_b"], p["w1"], p["b1"], p["w2"], p["b2"])
    return x2.reshape(B, S, D)


# ----------------------------------------------------------------------------- Pure-JAX reference


def _ln_ref(x, g, b, eps=1e-5):
    mean = x.mean(-1, keepdims=True)
    var = ((x - mean) ** 2).mean(-1, keepdims=True)
    return (x - mean) * jax.lax.rsqrt(var + eps) * g + b


def _reference(x, bias, params):
    n_head, d_k = params["n_head"], params["d_k"]
    B, S, D = x.shape
    scale = float(d_k) ** 0.5
    for p in params["layers"]:
        h = _ln_ref(x, p["ln1_g"], p["ln1_b"])
        q, k, v = h @ p["wq"], h @ p["wk"], h @ p["wv"]

        def to_heads(t):
            return t.reshape(B, S, n_head, d_k).transpose(0, 2, 1, 3)

        qh, kh, vh = to_heads(q), to_heads(k), to_heads(v)
        attn = (qh / scale) @ kh.transpose(0, 1, 3, 2) + bias[None]
        attn = jax.nn.softmax(attn, axis=-1)
        ctx = (attn @ vh).transpose(0, 2, 1, 3).reshape(B, S, n_head * d_k)
        x = x + ctx @ p["wo"]

        h2 = _ln_ref(x, p["ln2_g"], p["ln2_b"])
        f = h2 @ p["w1"] + p["b1"]
        f = 0.5 * f * (1.0 + jax.scipy.special.erf(f * 0.7071067811865476))  # exact GELU
        x = x + (f @ p["w2"] + p["b2"])
    return x


# ----------------------------------------------------------------------------- main


if __name__ == "__main__":
    key = jax.random.PRNGKey(0)
    B, S = 2, 16
    d_model, d_key, n_head, d_ff, num_layers = 32, 32, 4, 64, 2
    d_k = d_key // n_head

    keys = jax.random.split(key, 2 + num_layers)
    x = jax.random.normal(keys[0], (B, S, d_model), dtype=jnp.float32)
    bias = 0.1 * jax.random.normal(keys[1], (n_head, S, S), dtype=jnp.float32)

    layers = []
    for li in range(num_layers):
        lk = jax.random.split(keys[2 + li], 12)

        def w(k_, shape, fan_in):
            return jax.random.uniform(k_, shape, jnp.float32, -1.0, 1.0) / (fan_in ** 0.5)

        layers.append(dict(
            ln1_g=1.0 + 0.1 * jax.random.normal(lk[0], (d_model,), jnp.float32),
            ln1_b=0.1 * jax.random.normal(lk[1], (d_model,), jnp.float32),
            wq=w(lk[2], (d_model, d_key), d_model),
            wk=w(lk[3], (d_model, d_key), d_model),
            wv=w(lk[4], (d_model, d_key), d_model),
            wo=w(lk[5], (d_key, d_model), d_key),
            ln2_g=1.0 + 0.1 * jax.random.normal(lk[6], (d_model,), jnp.float32),
            ln2_b=0.1 * jax.random.normal(lk[7], (d_model,), jnp.float32),
            w1=w(lk[8], (d_model, d_ff), d_model),
            b1=w(lk[9], (d_ff,), d_model),
            w2=w(lk[10], (d_ff, d_model), d_ff),
            b2=w(lk[11], (d_model,), d_ff),
        ))
    raw_params = dict(layers=layers, n_head=n_head, d_k=d_k)

    ref = _reference(x, bias, raw_params)

    # Exact path (f32 MXU operands, full-precision reciprocals): tight tolerance.
    p32 = prepare_params(raw_params, use_bf16=False)
    out32 = jax.block_until_ready(transformer_encoder(x, bias, p32))
    assert out32.shape == (B, S, d_model), out32.shape
    err32 = float(jnp.max(jnp.abs(out32 - ref)))
    assert jnp.allclose(out32, ref, atol=1e-4, rtol=1e-4), \
        f"f32 path mismatch vs reference, max abs err={err32}"

    # Fast path (bf16 MXU operands / f32 accumulate, approx EUP reciprocal in softmax):
    # the recommended config for v6e/v7x; tolerance loosened for bf16 operand rounding.
    pbf = prepare_params(raw_params, use_bf16=True)
    outbf = jax.block_until_ready(transformer_encoder(x, bias, pbf))
    assert outbf.shape == (B, S, d_model), outbf.shape
    errbf = float(jnp.max(jnp.abs(outbf - ref)))
    assert jnp.allclose(outbf, ref, atol=5e-2, rtol=5e-2), \
        f"bf16 path mismatch vs reference, max abs err={errbf}"

    print("KERNEL_OK")
</pallas_src>

<mosaic_0001>
module attributes {stable_mosaic.version = 11 : i64} {
  func.func @kernel(%arg0: i32, %arg1: i32, %arg2: i32, %arg3: memref<32x32xf32, #tpu.memory_space<vmem>>, %arg4: memref<1x32xf32, #tpu.memory_space<vmem>>, %arg5: memref<1x32xf32, #tpu.memory_space<vmem>>, %arg6: memref<32x96xf32, #tpu.memory_space<vmem>>, %arg7: memref<32x96xf32, #tpu.memory_space<vmem>>, %arg8: memref<32x96xf32, #tpu.memory_space<vmem>>) attributes {dimension_semantics = [#tpu.dimension_semantics<parallel>, #tpu.dimension_semantics<parallel>, #tpu.dimension_semantics<arbitrary>], iteration_bounds = array<i64: 1, 1, 1>, scalar_prefetch = 0 : i64, scratch_operands = 1 : i64, tpu.core_type = #tpu.core_type<tc>, window_params = [{transform_indices = @transform_0, window_bounds = array<i64: 32, 32>}, {pipeline_mode = #tpu.pipeline_mode<synchronous>, transform_indices = @transform_1, window_bounds = array<i64: 1, 32>}, {pipeline_mode = #tpu.pipeline_mode<synchronous>, transform_indices = @transform_2, window_bounds = array<i64: 1, 32>}, {transform_indices = @transform_3, window_bounds = array<i64: 32, 96>}, {transform_indices = @transform_4, window_bounds = array<i64: 32, 96>}]} {
    %c0_i32 = arith.constant 0 : i32
    %0 = arith.cmpi eq, %arg2, %c0_i32 : i32
    %1 = arith.extui %0 : i1 to i32
    %c0_i32_0 = arith.constant 0 : i32
    %2 = arith.cmpi ne, %1, %c0_i32_0 : i32
    scf.if %2 {
      %cst_19 = arith.constant 0.000000e+00 : f32
      %34 = vector.broadcast %cst_19 : f32 to vector<32x96xf32>
      %c0_20 = arith.constant 0 : index
      %c0_21 = arith.constant 0 : index
      %35 = vector.load %arg8[%c0_20, %c0_21] : memref<32x96xf32, #tpu.memory_space<vmem>>, vector<32x96xf32>
      tpu.vector_store %arg8[%c0_20, %c0_21], %34 {strides = array<i32>} : memref<32x96xf32, #tpu.memory_space<vmem>>, vector<32x96xf32>,
    } else {
    }
    %c0 = arith.constant 0 : index
    %c0_1 = arith.constant 0 : index
    %3 = vector.load %arg3[%c0, %c0_1] : memref<32x32xf32, #tpu.memory_space<vmem>>, vector<32x32xf32>
    %cst = arith.constant dense<0.000000e+00> : vector<32xf32>
    %4 = vector.multi_reduction <add>, %3, %cst [1] : vector<32x32xf32> to vector<32xf32>
    %5 = vector.shape_cast %4 : vector<32xf32> to vector<32x1xf32>
    %cst_2 = arith.constant 3.200000e+01 : f32
    %6 = vector.broadcast %cst_2 : f32 to vector<32x1xf32>
    %7 = arith.divf %5, %6 : vector<32x1xf32>
    %8 = vector.broadcast %7 : vector<32x1xf32> to vector<32x32xf32>
    %9 = arith.subf %3, %8 : vector<32x32xf32>
    %10 = arith.mulf %9, %9 : vector<32x32xf32>
    %cst_3 = arith.constant dense<0.000000e+00> : vector<32xf32>
    %11 = vector.multi_reduction <add>, %10, %cst_3 [1] : vector<32x32xf32> to vector<32xf32>
    %12 = vector.shape_cast %11 : vector<32xf32> to vector<32x1xf32>
    %cst_4 = arith.constant 3.200000e+01 : f32
    %13 = vector.broadcast %cst_4 : f32 to vector<32x1xf32>
    %14 = arith.divf %12, %13 : vector<32x1xf32>
    %cst_5 = arith.constant 9.99999974E-6 : f32
    %15 = vector.broadcast %cst_5 : f32 to vector<32x1xf32>
    %16 = arith.addf %14, %15 : vector<32x1xf32>
    %17 = math.rsqrt %16 : vector<32x1xf32>
    %18 = vector.broadcast %17 : vector<32x1xf32> to vector<32x32xf32>
    %19 = arith.mulf %9, %18 : vector<32x32xf32>
    %c0_6 = arith.constant 0 : index
    %c0_7 = arith.constant 0 : index
    %20 = vector.load %arg4[%c0_6, %c0_7] : memref<1x32xf32, #tpu.memory_space<vmem>>, vector<1x32xf32>
    %21 = vector.broadcast %20 : vector<1x32xf32> to vector<32x32xf32>
    %22 = arith.mulf %19, %21 : vector<32x32xf32>
    %c0_8 = arith.constant 0 : index
    %c0_9 = arith.constant 0 : index
    %23 = vector.load %arg5[%c0_8, %c0_9] : memref<1x32xf32, #tpu.memory_space<vmem>>, vector<1x32xf32>
    %24 = vector.broadcast %23 : vector<1x32xf32> to vector<32x32xf32>
    %25 = arith.addf %22, %24 : vector<32x32xf32>
    %c0_10 = arith.constant 0 : index
    %c0_11 = arith.constant 0 : index
    %26 = vector.load %arg8[%c0_10, %c0_11] : memref<32x96xf32, #tpu.memory_space<vmem>>, vector<32x96xf32>
    %c0_12 = arith.constant 0 : index
    %c0_13 = arith.constant 0 : index
    %27 = vector.load %arg6[%c0_12, %c0_13] : memref<32x96xf32, #tpu.memory_space<vmem>>, vector<32x96xf32>
    %cst_14 = arith.constant dense<0.000000e+00> : vector<32x96xf32>
    %28 = tpu.matmul %25, %27, %cst_14 {dimension_numbers = #tpu.dot_dimension_numbers<[1], [0], [0], [1], [0, 0, 1, 1], [], []>} : vector<32x32xf32>, vector<32x96xf32>, vector<32x96xf32> -> vector<32x96xf32>
    %29 = arith.addf %26, %28 : vector<32x96xf32>
    %c0_15 = arith.constant 0 : index
    %c0_16 = arith.constant 0 : index
    %30 = vector.load %arg8[%c0_15, %c0_16] : memref<32x96xf32, #tpu.memory_space<vmem>>, vector<32x96xf32>
    tpu.vector_store %arg8[%c0_15, %c0_16], %29 {strides = array<i32>} : memref<32x96xf32, #tpu.memory_space<vmem>>, vector<32x96xf32>,
    %c0_i32_17 = arith.constant 0 : i32
    %31 = arith.cmpi eq, %arg2, %c0_i32_17 : i32
    %32 = arith.extui %31 : i1 to i32
    %c0_i32_18 = arith.constant 0 : i32
    %33 = arith.cmpi ne, %32, %c0_i32_18 : i32
    scf.if %33 {
      %c0_19 = arith.constant 0 : index
      %c0_20 = arith.constant 0 : index
      %34 = vector.load %arg8[%c0_19, %c0_20] : memref<32x96xf32, #tpu.memory_space<vmem>>, vector<32x96xf32>
      %c0_21 = arith.constant 0 : index
      %c0_22 = arith.constant 0 : index
      %35 = vector.load %arg7[%c0_21, %c0_22] : memref<32x96xf32, #tpu.memory_space<vmem>>, vector<32x96xf32>
      tpu.vector_store %arg7[%c0_21, %c0_22], %34 {strides = array<i32>} : memref<32x96xf32, #tpu.memory_space<vmem>>, vector<32x96xf32>,
    } else {
    }
    return
  }
  func.func @transform_0(%arg0: i32, %arg1: i32, %arg2: i32) -> (i32, i32) {
    %c0_i32 = arith.constant 0 : i32
    return %arg0, %arg2 : i32, i32
  }
  func.func @transform_1(%arg0: i32, %arg1: i32, %arg2: i32) -> (i32, i32) {
    %c0_i32 = arith.constant 0 : i32
    %c0_i32_0 = arith.constant 0 : i32
    %c0_i32_1 = arith.constant 0 : i32
    return %c0_i32, %c0_i32_0 : i32, i32
  }
  func.func @transform_2(%arg0: i32, %arg1: i32, %arg2: i32) -> (i32, i32) {
    %c0_i32 = arith.constant 0 : i32
    %c0_i32_0 = arith.constant 0 : i32
    %c0_i32_1 = arith.constant 0 : i32
    return %c0_i32, %c0_i32_0 : i32, i32
  }
  func.func @transform_3(%arg0: i32, %arg1: i32, %arg2: i32) -> (i32, i32) {
    %c0_i32 = arith.constant 0 : i32
    return %arg2, %arg1 : i32, i32
  }
  func.func @transform_4(%arg0: i32, %arg1: i32, %arg2: i32) -> (i32, i32) {
    %c0_i32 = arith.constant 0 : i32
    return %arg0, %arg1 : i32, i32
  }
}

</mosaic_0001>

<bundles_post_ra>
// kernel: tpu_custom_call.1
= control target key start
LH: loop header
LB: loop body
LE: loop exit
PB: predicated region body
PF: predicated region fallthrough
CT: control target
= control target key end

     0   :  { %9 = vsyncpa [#allocation4], 0  ;;  %s515_s0 = inlined_call_operand.hbm [shape: f32[32,32], index: 0, kind: input, shape index: {}]   ;;  %s516_s1 = inlined_call_operand.vmem [shape: f32[1,32], index: 1, kind: input, shape index: {}]   ;;  %s517_s2 = inlined_call_operand.vmem [shape: f32[1,32], index: 2, kind: input, shape index: {}]   ;;  %s518_s3 = inlined_call_operand.hbm [shape: f32[32,96], index: 3, kind: input, shape index: {}]   ;;  %s519_s4 = inlined_call_operand.hbm [shape: f32[32,96], index: 4, kind: output, shape index: {}]  }
   0x1   :  { %10 = vsyncpa [#allocation7], 0 }
   0x2   :  { %11 = vsyncpa [#allocation5], 0  ;;  %s404_s15 = smov [#allocation3]   ;;  %s332_s19 = scalar_lea.hbm %s515_s0, 512 }
   0x3   :  { %s17_s16 = sshll.u32 %s404_s15, 4  ;;  %p333_p0 = scmp.ne.s32.totalorder %s515_s0, %s332_s19  ;;  %s18_s16 = int_to_ptr.vmem [resolvable:$true] %s17_s16 }
   0x4   :  { %p336_p1 = scmp.lt.u32.totalorder %s332_s19, %s515_s0 }
   0x6   :  { %p338_p2 = pnand %p336_p1, %p333_p0 }
   0x8   :  { %341 = shalt.err (!%p338_p2)
}
   0x9   :  { %s342_s24 = scalar_lea.vmem %s18_s16, 512  ;;  %p347_p4 = scmp.lt.s32.totalorder %s18_s16, %s18_s16 }
   0xa   :  { %p343_p3 = scmp.ne.s32.totalorder %s18_s16, %s342_s24  ;;  %p348_p5 = scmp.lt.s32.totalorder %s342_s24, %s342_s24 }
   0xc   :  { %p349_p6 = por %p348_p5, %p347_p4 }
   0xe   :  { %p350_p7 = pnand %p349_p6, %p343_p3 }
  0x10   :  { %353 = shalt.err (!%p350_p7)
}
  0x11   :  { %s405_s25 = smov 128   ;;  %s406_s26 = smov 8  }
  0x12   :  { %23 = dma.hbm_to_vmem [thread:$0]  %s515_s0, 512, %s18_s16, [#allocation4], %s405_s25, %s405_s25, %s406_s26  }
  0x13   :  { %s407_s29 = smov [#allocation6]   ;;  %s354_s7 = scalar_lea.hbm %s518_s3, 512 }
  0x14   :  { %s33_s30 = sshll.u32 %s407_s29, 4  ;;  %p355_p8 = scmp.ne.s32.totalorder %s518_s3, %s354_s7  ;;  %s34_s30 = int_to_ptr.vmem [resolvable:$true] %s33_s30 }
  0x15   :  { %p358_p9 = scmp.lt.u32.totalorder %s354_s7, %s518_s3 }
  0x17   :  { %p360_p10 = pnand %p358_p9, %p355_p8 }
  0x19   :  { %363 = shalt.err (!%p360_p10)
}
  0x1a   :  { %s364_s12 = scalar_lea.vmem %s34_s30, 512  ;;  %p369_p12 = scmp.lt.s32.totalorder %s34_s30, %s34_s30 }
  0x1b   :  { %p365_p11 = scmp.ne.s32.totalorder %s34_s30, %s364_s12  ;;  %p370_p13 = scmp.lt.s32.totalorder %s364_s12, %s364_s12 }
  0x1d   :  { %p371_p0 = por %p370_p13, %p369_p12 }
  0x1f   :  { %p372_p1 = pnand %p371_p0, %p365_p11 }
  0x21   :  { %375 = shalt.err (!%p372_p1)
}
  0x22   :  { %39 = dma.hbm_to_vmem [thread:$0]  %s518_s3, 512, %s34_s30, [#allocation7], %s405_s25, %s405_s25, %s406_s26  }
  0x23   :  { %398 = dma.done.wait [#allocation4], 512  }
  0x24   :  { %399 = vsyncadd [#allocation4], 4294966784 }
  0x25   :  { %400 = dma.done.wait [#allocation7], 512  }
  0x26   :  { %401 = vsyncadd [#allocation7], 4294966784  ;;  %vm59_vm0 = vcmask 261120   ;;  %v55_v0 = vld [vmem:[#allocation3] sm:$0xff]  ;;  %v56_v1 = vld [vmem:[#allocation3 + $0x8] sm:$0xff]  ;;  %vm50_vm1 = vcmask 785408  }
  0x27   :  { %v57_v2 = vld [vmem:[#allocation3 + $0x10] sm:$0xff]  ;;  %v60_v3 = vsel %vm59_vm0, %v55_v0, 0.0  ;;  %v63_v4 = vsel %vm59_vm0, %v56_v1, 0.0  ;;  %v58_v5 = vld [vmem:[#allocation3 + $0x18] sm:$0xff]  ;;  %v139_v28 = vld [vmem:[#allocation6] sm:$0xff]  ;;  %v408_v34 = vmov 0.0  }
  0x28   :  { %61 = vadd.xlane.f32.xlu0 %v60_v3  ;;  %64 = vadd.xlane.f32.xlu1 %v63_v4  ;;  %v66_v6 = vsel %vm59_vm0, %v57_v2, 0.0  ;;  %v69_v7 = vsel %vm59_vm0, %v58_v5, 0.0  ;;  %v140_v29 = vld [vmem:[#allocation6 + $0x8] sm:$0xff]  ;;  %v141_v30 = vld [vmem:[#allocation6 + $0x10] sm:$0xff]  ;;  %v142_v32 = vld [vmem:[#allocation6 + $0x18] sm:$0xff]  ;;  %52 = vst.msk [vmem:[#allocation2 + $0x8] sm:$0xff] %vm50_vm1, %v408_v34 }
  0x29   :  { %v306_v31 = vpack.c.bf16 %v140_v29, %v139_v28  ;;  %v310_v33 = vpack.c.bf16 %v142_v32, %v141_v30  ;;  %51 = vst.msk [vmem:[#allocation2] sm:$0xff] %vm50_vm1, %v408_v34  ;;  %53 = vst.msk [vmem:[#allocation2 + $0x10] sm:$0xff] %vm50_vm1, %v408_v34  ;;  %v278_v48 = vld [vmem:[%s516_s1] ss:$0 sm:$0xff]  ;;  %s409_s1 = smov [#allocation8]  }
  0x2a   :  { %54 = vst.msk [vmem:[#allocation2 + $0x18] sm:$0xff] %vm50_vm1, %v408_v34  ;;  %v279_v50 = vld [vmem:[%s517_s2] ss:$0 sm:$0xff]  ;;  %s265_s2 = sshll.u32 %s409_s1, 4  ;;  %s266_s2 = int_to_ptr.vmem [resolvable:$true] %s265_s2 }
  0x2b   :  { %307 = vmatprep.subr.bf16.mxu0 %v306_v31  ;;  %314 = vmatprep.subr.bf16.mxu1 %v306_v31  ;;  %s376_s17 = scalar_lea.vmem %s266_s2, 512  ;;  %p381_p3 = scmp.lt.s32.totalorder %s266_s2, %s266_s2 }
  0x2c   :  { %67 = vadd.xlane.f32.xlu0 %v66_v6  ;;  %70 = vadd.xlane.f32.xlu1 %v69_v7  ;;  %p377_p2 = scmp.ne.s32.totalorder %s266_s2, %s376_s17  ;;  %p382_p4 = scmp.lt.s32.totalorder %s376_s17, %s376_s17 }
  0x2d   :  { %309 = vmatpush3.bf16.msra.mxu0 %v306_v31  ;;  %316 = vmatpush3.bf16.msra.mxu1 %v306_v31 }
  0x2e   :  { %311 = vmatprep.subr.bf16.mxu0 %v310_v33  ;;  %315 = vmatprep.subr.bf16.mxu1 %v310_v33  ;;  %p383_p5 = por %p382_p4, %p381_p3 }
  0x30   :  { %p384_p6 = pnand %p383_p5, %p377_p2 }
  0x31   :  { %313 = vmatpush3.bf16.msra.mxu0 %v310_v33  ;;  %317 = vmatpush3.bf16.msra.mxu1 %v310_v33  ;;  %v138_v6 = vld [vmem:[#allocation2 + $0x18] sm:$0xff] }
  0xb5   :  { %v62_v8 = vpop.xlane.xlu0 %61  ;;  %v65_v9 = vpop.xlane.xlu1 %64 }
  0xb6   :  { %v73_v10 = vmul.f32 0.03125, %v62_v8  ;;  %v74_v11 = vmul.f32 0.03125, %v65_v9  ;;  %v137_v8 = vld [vmem:[#allocation2 + $0x10] sm:$0xff] }
  0xb8   :  { %v77_v12 = vsub.f32 %v55_v0, %v73_v10  ;;  %v469_v13 = vsub.f32 %v56_v1, %v74_v11  ;;  %v136_v1 = vld [vmem:[#allocation2 + $0x8] sm:$0xff] }
  0xb9   :  { %v68_v14 = vpop.xlane.xlu0 %67  ;;  %v71_v15 = vpop.xlane.xlu1 %70 }
  0xba   :  { %v75_v16 = vmul.f32 0.03125, %v68_v14  ;;  %v76_v17 = vmul.f32 0.03125, %v71_v15  ;;  %v81_v18 = vmul.f32 %v77_v12, %v77_v12  ;;  %v82_v19 = vmul.f32 %v469_v13, %v469_v13 }
  0xbc   :  { %v79_v20 = vsub.f32 %v57_v2, %v75_v16  ;;  %v80_v21 = vsub.f32 %v58_v5, %v76_v17  ;;  %v85_v22 = vsel %vm59_vm0, %v81_v18, 0.0  ;;  %v88_v23 = vsel %vm59_vm0, %v82_v19, 0.0  ;;  %v135_v2 = vld [vmem:[#allocation2] sm:$0xff] }
  0xbd   :  { %86 = vadd.xlane.f32.xlu0 %v85_v22 }
  0xbe   :  { %v83_v24 = vmul.f32 %v79_v20, %v79_v20  ;;  %v84_v25 = vmul.f32 %v80_v21, %v80_v21 }
  0xc0   :  { %v91_v26 = vsel %vm59_vm0, %v83_v24, 0.0  ;;  %v94_v27 = vsel %vm59_vm0, %v84_v25, 0.0 }
  0xc1   :  { %89 = vadd.xlane.f32.xlu0 %v88_v23  ;;  %92 = vadd.xlane.f32.xlu1 %v91_v26 }
  0xc5   :  { %95 = vadd.xlane.f32.xlu1 %v94_v27 }
 0x14a   :  { %v87_v35 = vpop.xlane.xlu0 %86 }
 0x14b   :  { %v97_v36 = vmul.f32 0.03125, %v87_v35 }
 0x14d   :  { %v101_v37 = vadd.f32 1e-05, %v97_v36 }
 0x14e   :  { %v93_v38 = vpop.xlane.xlu1 %92  ;;  %v90_v39 = vpop.xlane.xlu0 %89 }
 0x14f   :  { %324 = vrsqrt.f32 %v101_v37  ;;  %v99_v40 = vmul.f32 0.03125, %v93_v38  ;;  %v98_v41 = vmul.f32 0.03125, %v90_v39 }
 0x151   :  { %v103_v42 = vadd.f32 1e-05, %v99_v40  ;;  %v102_v43 = vadd.f32 1e-05, %v98_v41 }
 0x152   :  { %v96_v44 = vpop.xlane.xlu1 %95 }
 0x153   :  { %326 = vrsqrt.f32 %v103_v42  ;;  %v100_v45 = vmul.f32 0.03125, %v96_v44 }
 0x154   :  { %328 = vrsqrt.f32 %v102_v43 }
 0x155   :  { %v104_v46 = vadd.f32 1e-05, %v100_v45 }
 0x157   :  { %330 = vrsqrt.f32 %v104_v46 }
 0x159   :  { %v325_v47 = vpop.eup %324 }
 0x15a   :  { %v109_v49 = vmul.f32 %v325_v47, %v77_v12 }
 0x15c   :  { %v120_v51 = vmul.f32 %v278_v48, %v109_v49 }
 0x15d   :  { %v327_v52 = vpop.eup %326 }
 0x15e   :  { %v329_v53 = vpop.eup %328  ;;  %v131_v54 = vadd.f32 %v279_v50, %v120_v51  ;;  %v111_v55 = vmul.f32 %v327_v52, %v79_v20 }
 0x15f   :  { %v110_v56 = vmul.f32 %v329_v53, %v469_v13 }
 0x160   :  { %300 = vmatprep.mubr.msk.f32.mxu0 %vm59_vm0, %v131_v54  ;;  %v122_v57 = vmul.f32 %v278_v48, %v111_v55 }
 0x161   :  { %v331_v58 = vpop.eup %330  ;;  %v121_v59 = vmul.f32 %v278_v48, %v110_v56 }
 0x162   :  { %v133_v60 = vadd.f32 %v279_v50, %v122_v57  ;;  %v112_v61 = vmul.f32 %v331_v58, %v80_v21 }
 0x163   :  { %v132_v62 = vadd.f32 %v279_v50, %v121_v59 }
 0x164   :  { %303 = vmatprep.mubr.msk.f32.mxu1 %vm59_vm0, %v133_v60  ;;  %v123_v63 = vmul.f32 %v278_v48, %v112_v61 }
 0x165   :  { %301 = vmatmul.mubr.msk.f32.vlgmr.msra.gmra.mrb[0].mxu0 %vm59_vm0, %v132_v62 }
 0x166   :  { %v134_v0 = vadd.f32 %v279_v50, %v123_v63 }
 0x168   :  { %304 = vmatmul.mubr.msk.f32.vlgmr.msra.gmra.mrb[0].mxu1 %vm59_vm0, %v134_v0 }
 0x238   :  { %v302_v3 = vpop.f32.mrb[0].mxu0 }
 0x239   :  { %v241_v4 = vadd.f32 %v302_v3, %v136_v1  ;;  %v221_v5 = vpop.f32.mrb[1].mxu0 }
 0x23a   :  { %v240_v7 = vadd.f32 %v221_v5, %v135_v2 }
 0x23b   :  { %246 = vst.msk [vmem:[#allocation2 + $0x8] sm:$0xff] %vm50_vm1, %v241_v4  ;;  %v305_v9 = vpop.f32.mrb[0].mxu1 }
 0x23c   :  { %245 = vst.msk [vmem:[#allocation2] sm:$0xff] %vm50_vm1, %v240_v7  ;;  %v243_v10 = vadd.f32 %v305_v9, %v138_v6  ;;  %v231_v11 = vpop.f32.mrb[1].mxu1 }
 0x23d   :  { %v242_v12 = vadd.f32 %v231_v11, %v137_v8 }
 0x23e   :  { %248 = vst.msk [vmem:[#allocation2 + $0x18] sm:$0xff] %vm50_vm1, %v243_v10 }
 0x23f   :  { %247 = vst.msk [vmem:[#allocation2 + $0x10] sm:$0xff] %vm50_vm1, %v242_v12 }
 0x242   :  { %v253_v13 = vld [vmem:[#allocation2 + $0x8] sm:$0xff] }
 0x243   :  { %v252_v14 = vld [vmem:[#allocation2] sm:$0xff]  ;;  %257 = vst.msk [vmem:[#allocation8 + $0x8] sm:$0xff] %vm50_vm1, %v253_v13 }
 0x244   :  { %256 = vst.msk [vmem:[#allocation8] sm:$0xff] %vm50_vm1, %v252_v14 }
 0x245   :  { %v255_v15 = vld [vmem:[#allocation2 + $0x18] sm:$0xff] }
 0x246   :  { %v254_v16 = vld [vmem:[#allocation2 + $0x10] sm:$0xff]  ;;  %259 = vst.msk [vmem:[#allocation8 + $0x18] sm:$0xff] %vm50_vm1, %v255_v15 }
 0x247   :  { %258 = vst.msk [vmem:[#allocation8 + $0x10] sm:$0xff] %vm50_vm1, %v254_v16 }
 0x248   :  { %387 = shalt.err (!%p384_p6)
}
 0x249   :  { %s388_s20 = scalar_lea.hbm %s519_s4, 512 }
 0x24a   :  { %p389_p7 = scmp.ne.s32.totalorder %s519_s4, %s388_s20  ;;  %p392_p8 = scmp.lt.u32.totalorder %s388_s20, %s519_s4 }
 0x24c   :  { %p394_p9 = pnand %p392_p8, %p389_p7 }
 0x24e   :  { %397 = shalt.err (!%p394_p9)
}
 0x24f   :  { %271 = dma.vmem_to_hbm [thread:$0]  %s266_s2, 512, %s519_s4, [#allocation5], %s405_s25, %s405_s25, %s406_s26  }
 0x250   :  { %402 = dma.done.wait [#allocation5], 512  }
 0x251   :  { %403 = vsyncadd [#allocation5], 4294966784 }
 0x252   :  { %275 = vsyncpa [#allocation4], 1 }
 0x253   :  { %276 = vsyncpa [#allocation7], 1 }
 0x254   :  { %277 = vsyncpa [#allocation5], 1 }

</bundles_post_ra>
